<compile_context>
chip_gen: v6e
topology: v6e:2x2x1
jax: 0.10.0
libtpu: 0.0.40
codegen_flags: <defaults>
</compile_context>

<pallas_src>
import jax
import jax.numpy as jnp
from jax.experimental import pallas as pl
from jax.experimental.pallas import tpu as pltpu

NEG_SLOPE = 0.01      # nn.LeakyReLU default
BN_EPS = 1e-5         # nn.BatchNorm1d default
LANE = 128
SUBLANE = 8

_MEGACORE_MIN_ROWS_PER_TC = 128     # don't split tiny batches across TCs
_SINGLE_BUFFER_BYTES = 4 << 20      # single-buffer grid-invariant blocks past this


def _round_up(x, m):
    return ((x + m - 1) // m) * m


def _cdiv(a, b):
    return (a + b - 1) // b


def _vmem_bytes(shape, dtype):
    """VMEM footprint of one block, including (sublane, lane) padding."""
    shape = list(shape)
    if len(shape) >= 1:
        shape[-1] = _round_up(shape[-1], LANE)
    if len(shape) >= 2:
        shape[-2] = _round_up(shape[-2], SUBLANE)
    n = 1
    for s in shape:
        n *= int(s)
    return n * jnp.dtype(dtype).itemsize


def _device_info():
    """(vmem_capacity_bytes, has_two_tensorcores) with conservative fallbacks."""
    vmem_cap = 64 << 20        # v7x per-TC size: safe lower bound everywhere
    kind = ""
    try:
        kind = jax.devices()[0].device_kind.lower()
    except Exception:
        pass
    try:
        info = pltpu.get_tpu_info()
        vmem_cap = int(getattr(info, "vmem_capacity_bytes", vmem_cap))
    except Exception:
        pass
    # v5e / v6e are single-TensorCore chips: the row grid is a serial loop, so
    # never split just to manufacture extra grid steps.  v7x-class (and other
    # megacore) chips shard a "parallel" grid axis across 2 TCs.
    single_tc = any(t in kind for t in ("v5 lite", "v5e", "v5litepod", "v6 lite", "v6e"))
    two_tc = (not single_tc) and any(t in kind for t in ("v7", "7x", "v3", "v4", "v5p"))
    return vmem_cap, two_tc


# ------------------------------ Pallas kernel -------------------------------

def _make_fc_kernel(n_hidden):
    """Whole prediction head, statically unrolled.

    Ref order: x, w0, b0, [w_hidden(nh,D,D), b_hidden(nh,1,D)], w_fin, b_fin, out.
    BN is pre-folded into W/b, so each hidden layer is Linear -> bias -> LeakyReLU.
    """

    def kernel(*refs):
        x_ref = refs[0]
        w0_ref, b0_ref = refs[1], refs[2]
        if n_hidden > 0:
            wh_ref, bh_ref = refs[3], refs[4]
            wf_ref, bf_ref = refs[5], refs[6]
        else:
            wf_ref, bf_ref = refs[3], refs[4]
        o_ref = refs[-1]

        def linear_act(y, w, b):
            # MXU matmul (bf16 or f32 operands, f32 accumulation).
            y = jnp.dot(y.astype(w.dtype), w, preferred_element_type=jnp.float32)
            y = y + b                                 # bias (Dropout eval = id)
            return jnp.maximum(y, NEG_SLOPE * y)      # LeakyReLU (one VALU max)

        y = x_ref[...].astype(jnp.float32)
        y = linear_act(y, w0_ref[...], b0_ref[...])
        for i in range(n_hidden):                     # static unroll
            y = linear_act(y, wh_ref[i], bh_ref[i])
        y = jnp.dot(y.astype(wf_ref.dtype), wf_ref[...],
                    preferred_element_type=jnp.float32)
        o_ref[...] = (y + bf_ref[...]).astype(o_ref.dtype)

    return kernel


# ----------------------------- BN fold (wrapper) -----------------------------

def _fold_bn_into_next(params):
    """Fold each fused layer's BN(eval) scale/shift into the next layer.

    y = LeakyReLU(x@W_i + b_i) * s_i + t_i  followed by  y@W_j + b_j
    ==  LeakyReLU(x@W_i + b_i) @ (diag(s_i) W_j)  +  (b_j + t_i @ W_j)

    Returns a list of (W_t, b) per Linear, W_t pre-transposed (Din, Dout),
    biases as f32 (1, Dout).  Folding is done in f32, W cast back to its dtype.
    """
    folded = []
    pending = None   # (scale, shift) from the previous fused layer
    for layer in params:
        if layer[0] == "fused":
            _, w_t, b, scale, shift = layer
        else:
            _, w_t, b = layer
            scale = shift = None
        w_dtype = w_t.dtype
        w32 = w_t.astype(jnp.float32)
        b32 = b.astype(jnp.float32)
        if pending is not None:
            s_prev, t_prev = pending
            b32 = b32 + t_prev @ w32          # t . W  (original, unscaled W)
            w32 = w32 * s_prev[:, None]       # diag(s) @ W
        folded.append((w32.astype(w_dtype), b32.reshape(1, -1)))
        pending = (scale, shift) if scale is not None else None
    return folded


# --------------------------------- wrapper ----------------------------------

def _choose_row_tile(n_rows, max_tile, two_tensorcores):
    """Largest convenient row tile (multiple of 8, <= max_tile).

    Single-TC chips: one big tile / as few grid steps as possible.
    Two-TC chips: an even number of equal blocks so both cores get work."""
    n8 = _round_up(max(n_rows, 1), SUBLANE)
    max_tile = max(SUBLANE, (max_tile // SUBLANE) * SUBLANE)
    if n8 <= max_tile:
        if two_tensorcores and n8 >= 2 * _MEGACORE_MIN_ROWS_PER_TC:
            return _round_up(_cdiv(n8, 2), SUBLANE)   # 2 equal blocks
        return n8                                     # single grid step
    steps = _cdiv(n8, max_tile)
    if two_tensorcores and steps % 2 == 1:
        steps += 1                                    # balanced across 2 TCs
    return _round_up(_cdiv(n8, steps), SUBLANE)


def _invariant_spec(shape, nbytes):
    """BlockSpec for a grid-invariant operand (index_map always zeros).

    Large weight blocks are single-buffered (no benefit from double-buffering a
    constant block; halves VMEM footprint for wide d_FC on v7x's 64 MiB VMEM)."""
    ndim = len(shape)
    index_map = lambda i: (0,) * ndim
    if nbytes >= _SINGLE_BUFFER_BYTES:
        return pl.BlockSpec(shape, index_map, pipeline_mode=pl.Buffered(1))
    return pl.BlockSpec(shape, index_map)


def fc_forward(params, h, *, max_rows_per_tile=1024):
    """Run the whole FC stack as a single pallas_call."""
    N, d_in = h.shape
    out_dtype = h.dtype

    folded = _fold_bn_into_next(params)
    (w0, b0), hidden, (w_fin, b_fin) = folded[0], folded[1:-1], folded[-1]
    n_hidden = len(hidden)
    d_fc, n_tasks = w_fin.shape

    # bf16 weights -> cast the activations too (identical numerics to the
    # in-kernel cast before the first matmul, but halves the x HBM read).
    if jnp.dtype(w0.dtype).itemsize < jnp.dtype(h.dtype).itemsize:
        h = h.astype(w0.dtype)

    vmem_cap, two_tc = _device_info()
    tm = _choose_row_tile(N, max_rows_per_tile, two_tc)
    n_pad = _round_up(N, tm)
    if n_pad != N:
        h = jnp.pad(h, ((0, n_pad - N), (0, 0)))
    n_steps = n_pad // tm

    # Output path: lane-padded slab only for the single-step latency path;
    # otherwise write the narrow (n_tasks-wide) result directly (block last dim
    # == full array dim, so it is a legal BlockSpec) -- 32x fewer output bytes
    # and no extra wrapper column-slice pass.
    wide_out = (n_steps == 1)
    n_out = _round_up(n_tasks, LANE) if wide_out else n_tasks
    w_fin_p = jnp.pad(w_fin, ((0, 0), (0, n_out - n_tasks))) if n_out != n_tasks else w_fin
    b_fin_p = jnp.pad(b_fin, ((0, 0), (0, n_out - n_tasks))) if n_out != n_tasks else b_fin

    inputs = [h]
    in_specs = [pl.BlockSpec((tm, d_in), lambda i: (i, 0))]
    vmem_need = 2 * _vmem_bytes((tm, d_in), h.dtype)

    def _add_invariant(arr):
        nonlocal vmem_need
        nbytes = _vmem_bytes(arr.shape, arr.dtype)
        inputs.append(arr)
        in_specs.append(_invariant_spec(arr.shape, nbytes))
        vmem_need += 2 * nbytes

    _add_invariant(w0)
    _add_invariant(b0)
    if n_hidden > 0:
        wh = jnp.stack([w for w, _ in hidden])          # (nh, d_fc, d_fc)
        bh = jnp.stack([b for _, b in hidden])          # (nh, 1,   d_fc)
        _add_invariant(wh)
        _add_invariant(bh)
    _add_invariant(w_fin_p)
    _add_invariant(b_fin_p)

    vmem_need += 2 * _vmem_bytes((tm, n_out), out_dtype)                 # output block
    vmem_need += 4 * _vmem_bytes((tm, max(d_fc, d_in, n_out)), jnp.float32)  # act temps

    vmem_limit = int(min(max(vmem_need + (16 << 20), 32 << 20),
                         max(vmem_cap - (4 << 20), 16 << 20)))

    out = pl.pallas_call(
        _make_fc_kernel(n_hidden),
        out_shape=jax.ShapeDtypeStruct((n_pad, n_out), out_dtype),
        grid_spec=pltpu.PrefetchScalarGridSpec(
            num_scalar_prefetch=0,
            grid=(n_steps,),
            in_specs=in_specs,
            out_specs=pl.BlockSpec((tm, n_out), lambda i: (i, 0)),
        ),
        compiler_params=pltpu.CompilerParams(
            dimension_semantics=("parallel",),
            vmem_limit_bytes=vmem_limit,
        ),
    )(*inputs)

    if wide_out:
        return out[:N, :n_tasks]
    return out if n_pad == N else out[:N]


# --------------------------- parameter building -----------------------------

def build_layer_dims(d_graph_layer, d_FC_layer, n_FC_layer, n_tasks):
    """Mirror the torch ModuleList construction order (if / if / else)."""
    layers = []
    for j in range(n_FC_layer):
        if j == 0:
            layers.append(("fused", d_graph_layer, d_FC_layer))
        if j == n_FC_layer - 1:
            layers.append(("linear", d_FC_layer, n_tasks))
        else:
            layers.append(("fused", d_FC_layer, d_FC_layer))
    return layers


def init_fc_params(key, d_graph_layer, d_FC_layer, n_FC_layer, n_tasks,
                   param_dtype=jnp.float32):
    """Weights stored pre-transposed (Din, Dout); BN(eval) kept as scale/shift
    (folded into the next layer's W/b inside fc_forward)."""
    layer_dims = build_layer_dims(d_graph_layer, d_FC_layer, n_FC_layer, n_tasks)
    params = []
    for kind, din, dout in layer_dims:
        key, kw, kb, kg, kbt, km, kv = jax.random.split(key, 7)
        w_t = (jax.random.normal(kw, (din, dout), jnp.float32) * 0.1).astype(param_dtype)
        b = jax.random.normal(kb, (dout,), jnp.float32) * 0.1
        if kind == "fused":
            gamma = jax.random.uniform(kg, (dout,), jnp.float32, 0.5, 1.5)
            beta = jax.random.normal(kbt, (dout,), jnp.float32) * 0.1
            running_mean = jax.random.normal(km, (dout,), jnp.float32) * 0.1
            running_var = jax.random.uniform(kv, (dout,), jnp.float32, 0.5, 1.5)
            # (y - mean) / sqrt(var + eps) * gamma + beta  ==  y*scale + shift
            scale = gamma / jnp.sqrt(running_var + BN_EPS)
            shift = beta - running_mean * scale
            params.append(("fused", w_t, b, scale, shift))
        else:
            params.append(("linear", w_t, b))
    return params


# ------------------------------- reference ----------------------------------

def fc_forward_ref(params, h):
    """Pure-JAX reference mirroring the torch module (eval) layer by layer."""
    y = h.astype(jnp.float32)
    for layer in params:
        if layer[0] == "fused":
            _, w_t, b, scale, shift = layer
            z = jnp.dot(y.astype(w_t.dtype), w_t, preferred_element_type=jnp.float32)
            z = z + b                                     # Linear (+ Dropout eval = id)
            z = jnp.where(z >= 0.0, z, NEG_SLOPE * z)     # LeakyReLU
            y = z * scale + shift                         # BatchNorm1d (running stats)
        else:
            _, w_t, b = layer
            y = jnp.dot(y.astype(w_t.dtype), w_t, preferred_element_type=jnp.float32)
            y = y + b
    return y.astype(h.dtype)


# ----------------------------------- main ------------------------------------

if __name__ == "__main__":
    key = jax.random.PRNGKey(0)

    # small shapes consistent with the module
    d_graph_layer = 32
    d_FC_layer = 64
    n_FC_layer = 3
    dropout = 0.1          # eval mode -> identity
    n_tasks = 4

    key, pkey, k1, k2 = jax.random.split(key, 4)
    params = init_fc_params(pkey, d_graph_layer, d_FC_layer, n_FC_layer, n_tasks)

    # 1) tiny batch -> single grid step, lane-padded (latency) output path
    N = 8
    h = jax.random.normal(k1, (N, d_graph_layer), jnp.float32)
    out = jax.block_until_ready(fc_forward(params, h))
    ref = fc_forward_ref(params, h)
    assert out.shape == (N, n_tasks), out.shape
    assert jnp.allclose(out, ref, atol=1e-4, rtol=1e-4), \
        float(jnp.max(jnp.abs(out - ref)))

    # 2) larger ragged batch with a forced small tile -> multi-step "parallel"
    #    row grid, narrow (n_tasks-wide) output path, zero row padding.
    N2 = 300
    h2 = jax.random.normal(k2, (N2, d_graph_layer), jnp.float32)
    out2 = jax.block_until_ready(fc_forward(params, h2, max_rows_per_tile=128))
    ref2 = fc_forward_ref(params, h2)
    assert out2.shape == (N2, n_tasks), out2.shape
    assert jnp.allclose(out2, ref2, atol=1e-4, rtol=1e-4), \
        float(jnp.max(jnp.abs(out2 - ref2)))

    # 3) bf16 weights (v6e/v7x MXU fast path): wrapper casts activations to
    #    bf16 too; the in-kernel epilogue stays in f32 (v5e-safe).
    params_bf16 = init_fc_params(pkey, d_graph_layer, d_FC_layer, n_FC_layer,
                                 n_tasks, param_dtype=jnp.bfloat16)
    out3 = jax.block_until_ready(fc_forward(params_bf16, h2))
    ref3 = fc_forward_ref(params_bf16, h2)
    assert out3.shape == (N2, n_tasks), out3.shape
    assert jnp.allclose(out3, ref3, atol=3e-2, rtol=3e-2), \
        float(jnp.max(jnp.abs(out3 - ref3)))

    print("KERNEL_OK")
</pallas_src>

<mosaic_0001>
module attributes {stable_mosaic.version = 11 : i64} {
  func.func @kernel(%arg0: i32, %arg1: memref<8x32xf32, #tpu.memory_space<vmem>>, %arg2: memref<32x64xf32, #tpu.memory_space<vmem>>, %arg3: memref<1x64xf32, #tpu.memory_space<vmem>>, %arg4: memref<2x64x64xf32, #tpu.memory_space<vmem>>, %arg5: memref<2x1x64xf32, #tpu.memory_space<vmem>>, %arg6: memref<64x128xf32, #tpu.memory_space<vmem>>, %arg7: memref<1x128xf32, #tpu.memory_space<vmem>>, %arg8: memref<8x128xf32, #tpu.memory_space<vmem>>) attributes {dimension_semantics = [#tpu.dimension_semantics<parallel>], iteration_bounds = array<i64: 1>, scalar_prefetch = 0 : i64, scratch_operands = 0 : i64, tpu.core_type = #tpu.core_type<tc>, window_params = [{transform_indices = @transform_0, window_bounds = array<i64: 8, 32>}, {pipeline_mode = #tpu.pipeline_mode<synchronous>, transform_indices = @transform_1, window_bounds = array<i64: 32, 64>}, {pipeline_mode = #tpu.pipeline_mode<synchronous>, transform_indices = @transform_2, window_bounds = array<i64: 1, 64>}, {pipeline_mode = #tpu.pipeline_mode<synchronous>, transform_indices = @transform_3, window_bounds = array<i64: 2, 64, 64>}, {pipeline_mode = #tpu.pipeline_mode<synchronous>, transform_indices = @transform_4, window_bounds = array<i64: 2, 1, 64>}, {pipeline_mode = #tpu.pipeline_mode<synchronous>, transform_indices = @transform_5, window_bounds = array<i64: 64, 128>}, {pipeline_mode = #tpu.pipeline_mode<synchronous>, transform_indices = @transform_6, window_bounds = array<i64: 1, 128>}, {transform_indices = @transform_7, window_bounds = array<i64: 8, 128>}]} {
    %c0 = arith.constant 0 : index
    %c0_0 = arith.constant 0 : index
    %0 = vector.load %arg1[%c0, %c0_0] : memref<8x32xf32, #tpu.memory_space<vmem>>, vector<8x32xf32>
    %c0_1 = arith.constant 0 : index
    %c0_2 = arith.constant 0 : index
    %1 = vector.load %arg2[%c0_1, %c0_2] : memref<32x64xf32, #tpu.memory_space<vmem>>, vector<32x64xf32>
    %c0_3 = arith.constant 0 : index
    %c0_4 = arith.constant 0 : index
    %2 = vector.load %arg3[%c0_3, %c0_4] : memref<1x64xf32, #tpu.memory_space<vmem>>, vector<1x64xf32>
    %cst = arith.constant dense<0.000000e+00> : vector<8x64xf32>
    %3 = tpu.matmul %0, %1, %cst {dimension_numbers = #tpu.dot_dimension_numbers<[1], [0], [0], [1], [0, 0, 1, 1], [], []>} : vector<8x32xf32>, vector<32x64xf32>, vector<8x64xf32> -> vector<8x64xf32>
    %4 = vector.broadcast %2 : vector<1x64xf32> to vector<8x64xf32>
    %5 = arith.addf %3, %4 : vector<8x64xf32>
    %cst_5 = arith.constant 0.00999999977 : f32
    %6 = vector.broadcast %cst_5 : f32 to vector<8x64xf32>
    %7 = arith.mulf %6, %5 : vector<8x64xf32>
    %8 = arith.maximumf %5, %7 : vector<8x64xf32>
    %c0_6 = arith.constant 0 : index
    %c0_7 = arith.constant 0 : index
    %c0_8 = arith.constant 0 : index
    %9 = vector.load %arg4[%c0_6, %c0_7, %c0_8] : memref<2x64x64xf32, #tpu.memory_space<vmem>>, vector<1x64x64xf32>
    %10 = vector.shape_cast %9 : vector<1x64x64xf32> to vector<64x64xf32>
    %c0_9 = arith.constant 0 : index
    %c0_10 = arith.constant 0 : index
    %c0_11 = arith.constant 0 : index
    %11 = vector.load %arg5[%c0_9, %c0_10, %c0_11] : memref<2x1x64xf32, #tpu.memory_space<vmem>>, vector<1x1x64xf32>
    %12 = vector.shape_cast %11 : vector<1x1x64xf32> to vector<1x64xf32>
    %cst_12 = arith.constant dense<0.000000e+00> : vector<8x64xf32>
    %13 = tpu.matmul %8, %10, %cst_12 {dimension_numbers = #tpu.dot_dimension_numbers<[1], [0], [0], [1], [0, 0, 1, 1], [], []>} : vector<8x64xf32>, vector<64x64xf32>, vector<8x64xf32> -> vector<8x64xf32>
    %14 = vector.broadcast %12 : vector<1x64xf32> to vector<8x64xf32>
    %15 = arith.addf %13, %14 : vector<8x64xf32>
    %cst_13 = arith.constant 0.00999999977 : f32
    %16 = vector.broadcast %cst_13 : f32 to vector<8x64xf32>
    %17 = arith.mulf %16, %15 : vector<8x64xf32>
    %18 = arith.maximumf %15, %17 : vector<8x64xf32>
    %c1 = arith.constant 1 : index
    %c0_14 = arith.constant 0 : index
    %c0_15 = arith.constant 0 : index
    %19 = vector.load %arg4[%c1, %c0_14, %c0_15] : memref<2x64x64xf32, #tpu.memory_space<vmem>>, vector<1x64x64xf32>
    %20 = vector.shape_cast %19 : vector<1x64x64xf32> to vector<64x64xf32>
    %c1_16 = arith.constant 1 : index
    %c0_17 = arith.constant 0 : index
    %c0_18 = arith.constant 0 : index
    %21 = vector.load %arg5[%c1_16, %c0_17, %c0_18] : memref<2x1x64xf32, #tpu.memory_space<vmem>>, vector<1x1x64xf32>
    %22 = vector.shape_cast %21 : vector<1x1x64xf32> to vector<1x64xf32>
    %cst_19 = arith.constant dense<0.000000e+00> : vector<8x64xf32>
    %23 = tpu.matmul %18, %20, %cst_19 {dimension_numbers = #tpu.dot_dimension_numbers<[1], [0], [0], [1], [0, 0, 1, 1], [], []>} : vector<8x64xf32>, vector<64x64xf32>, vector<8x64xf32> -> vector<8x64xf32>
    %24 = vector.broadcast %22 : vector<1x64xf32> to vector<8x64xf32>
    %25 = arith.addf %23, %24 : vector<8x64xf32>
    %cst_20 = arith.constant 0.00999999977 : f32
    %26 = vector.broadcast %cst_20 : f32 to vector<8x64xf32>
    %27 = arith.mulf %26, %25 : vector<8x64xf32>
    %28 = arith.maximumf %25, %27 : vector<8x64xf32>
    %c0_21 = arith.constant 0 : index
    %c0_22 = arith.constant 0 : index
    %29 = vector.load %arg6[%c0_21, %c0_22] : memref<64x128xf32, #tpu.memory_space<vmem>>, vector<64x128xf32>
    %cst_23 = arith.constant dense<0.000000e+00> : vector<8x128xf32>
    %30 = tpu.matmul %28, %29, %cst_23 {dimension_numbers = #tpu.dot_dimension_numbers<[1], [0], [0], [1], [0, 0, 1, 1], [], []>} : vector<8x64xf32>, vector<64x128xf32>, vector<8x128xf32> -> vector<8x128xf32>
    %c0_24 = arith.constant 0 : index
    %c0_25 = arith.constant 0 : index
    %31 = vector.load %arg7[%c0_24, %c0_25] : memref<1x128xf32, #tpu.memory_space<vmem>>, vector<1x128xf32>
    %32 = vector.broadcast %31 : vector<1x128xf32> to vector<8x128xf32>
    %33 = arith.addf %30, %32 : vector<8x128xf32>
    %c0_26 = arith.constant 0 : index
    %c0_27 = arith.constant 0 : index
    %34 = vector.load %arg8[%c0_26, %c0_27] : memref<8x128xf32, #tpu.memory_space<vmem>>, vector<8x128xf32>
    tpu.vector_store %arg8[%c0_26, %c0_27], %33 {strides = array<i32>} : memref<8x128xf32, #tpu.memory_space<vmem>>, vector<8x128xf32>,
    return
  }
  func.func @transform_0(%arg0: i32) -> (i32, i32) {
    %c0_i32 = arith.constant 0 : i32
    %c0_i32_0 = arith.constant 0 : i32
    return %arg0, %c0_i32 : i32, i32
  }
  func.func @transform_1(%arg0: i32) -> (i32, i32) {
    %c0_i32 = arith.constant 0 : i32
    %c0_i32_0 = arith.constant 0 : i32
    %c0_i32_1 = arith.constant 0 : i32
    return %c0_i32, %c0_i32_0 : i32, i32
  }
  func.func @transform_2(%arg0: i32) -> (i32, i32) {
    %c0_i32 = arith.constant 0 : i32
    %c0_i32_0 = arith.constant 0 : i32
    %c0_i32_1 = arith.constant 0 : i32
    return %c0_i32, %c0_i32_0 : i32, i32
  }
  func.func @transform_3(%arg0: i32) -> (i32, i32, i32) {
    %c0_i32 = arith.constant 0 : i32
    %c0_i32_0 = arith.constant 0 : i32
    %c0_i32_1 = arith.constant 0 : i32
    %c0_i32_2 = arith.constant 0 : i32
    return %c0_i32, %c0_i32_0, %c0_i32_1 : i32, i32, i32
  }
  func.func @transform_4(%arg0: i32) -> (i32, i32, i32) {
    %c0_i32 = arith.constant 0 : i32
    %c0_i32_0 = arith.constant 0 : i32
    %c0_i32_1 = arith.constant 0 : i32
    %c0_i32_2 = arith.constant 0 : i32
    return %c0_i32, %c0_i32_0, %c0_i32_1 : i32, i32, i32
  }
  func.func @transform_5(%arg0: i32) -> (i32, i32) {
    %c0_i32 = arith.constant 0 : i32
    %c0_i32_0 = arith.constant 0 : i32
    %c0_i32_1 = arith.constant 0 : i32
    return %c0_i32, %c0_i32_0 : i32, i32
  }
  func.func @transform_6(%arg0: i32) -> (i32, i32) {
    %c0_i32 = arith.constant 0 : i32
    %c0_i32_0 = arith.constant 0 : i32
    %c0_i32_1 = arith.constant 0 : i32
    return %c0_i32, %c0_i32_0 : i32, i32
  }
  func.func @transform_7(%arg0: i32) -> (i32, i32) {
    %c0_i32 = arith.constant 0 : i32
    %c0_i32_0 = arith.constant 0 : i32
    return %arg0, %c0_i32 : i32, i32
  }
}

</mosaic_0001>

<bundles_post_ra>
// kernel: tpu_custom_call.1
= control target key start
LH: loop header
LB: loop body
LE: loop exit
PB: predicated region body
PF: predicated region fallthrough
CT: control target
= control target key end

     0   :  { %12 = vsyncpa [#allocation3], 0  ;;  %s807_s0 = inlined_call_operand.hbm [shape: f32[8,32], index: 0, kind: input, shape index: {}]   ;;  %s808_s1 = inlined_call_operand.hbm [shape: f32[32,64], index: 1, kind: input, shape index: {}]   ;;  %s809_s2 = inlined_call_operand.vmem [shape: f32[1,64], index: 2, kind: input, shape index: {}]   ;;  %s810_s3 = inlined_call_operand.hbm [shape: f32[2,64,64], index: 3, kind: input, shape index: {}]   ;;  %s811_s4 = inlined_call_operand.vmem [shape: f32[2,1,64], index: 4, kind: input, shape index: {}]   ;;  %s812_s5 = inlined_call_operand.hbm [shape: f32[64,128], index: 5, kind: input, shape index: {}]   ;;  %s813_s6 = inlined_call_operand.vmem [shape: f32[1,128], index: 6, kind: input, shape index: {}]   ;;  %s814_s7 = inlined_call_operand.hbm [shape: f32[8,128], index: 7, kind: output, shape index: {}]  }
   0x1   :  { %13 = vsyncpa [#allocation6], 0 }
   0x2   :  { %14 = vsyncpa [#allocation9], 0 }
   0x3   :  { %15 = vsyncpa [#allocation4], 0  ;;  %s683_s24 = smov [#allocation5]  }
   0x4   :  { %s31_s25 = sshll.u32 %s683_s24, 4  ;;  %s32_s25 = int_to_ptr.vmem [resolvable:$true] %s31_s25 }
   0x5   :  { %s583_s26 = scalar_lea.vmem %s32_s25, 512  ;;  %p588_p1 = scmp.lt.s32.totalorder %s32_s25, %s32_s25 }
   0x6   :  { %p584_p0 = scmp.ne.s32.totalorder %s32_s25, %s583_s26  ;;  %p589_p2 = scmp.lt.s32.totalorder %s583_s26, %s583_s26 }
   0x8   :  { %p590_p3 = por %p589_p2, %p588_p1 }
   0xa   :  { %p591_p4 = pnand %p590_p3, %p584_p0 }
   0xc   :  { %594 = shalt.err (!%p591_p4)
}
   0xd   :  { %s684_s27 = smov 128   ;;  %s685_s28 = smov 8  }
   0xe   :  { %37 = dma.hbm_to_vmem [thread:$0]  %s808_s1, 512, %s32_s25, [#allocation6], %s684_s27, %s684_s27, %s685_s28  }
   0xf   :  { %s686_s8 = smov [#allocation2]   ;;  %s687_s10 = smov [#allocation7]  }
  0x10   :  { %s22_s9 = sshll.u32 %s686_s8, 4  ;;  %s45_s11 = sshll.u32 %s687_s10, 4  ;;  %s23_s9 = int_to_ptr.vmem [resolvable:$true] %s22_s9  ;;  %s46_s11 = int_to_ptr.vmem [resolvable:$true] %s45_s11 }
  0x11   :  { %s603_s12 = scalar_lea.vmem %s23_s9, 128  ;;  %p608_p6 = scmp.lt.s32.totalorder %s23_s9, %s23_s9 }
  0x12   :  { %p604_p5 = scmp.ne.s32.totalorder %s23_s9, %s603_s12  ;;  %p609_p7 = scmp.lt.s32.totalorder %s603_s12, %s603_s12 }
  0x14   :  { %p610_p8 = por %p609_p7, %p608_p6 }
  0x16   :  { %p611_p9 = pnand %p610_p8, %p604_p5 }
  0x18   :  { %614 = shalt.err (!%p611_p9)
}
  0x19   :  { %25 = dma.hbm_to_vmem [thread:$0]  %s807_s0, 128, %s23_s9, [#allocation3]  }
  0x1a   :  { %s623_s15 = scalar_lea.vmem %s46_s11, 2048  ;;  %p628_p11 = scmp.lt.s32.totalorder %s46_s11, %s46_s11 }
  0x1b   :  { %p624_p10 = scmp.ne.s32.totalorder %s46_s11, %s623_s15  ;;  %p629_p12 = scmp.lt.s32.totalorder %s623_s15, %s623_s15 }
  0x1d   :  { %p630_p13 = por %p629_p12, %p628_p11 }
  0x1f   :  { %p631_p0 = pnand %p630_p13, %p624_p10 }
  0x21   :  { %634 = shalt.err (!%p631_p0)
}
  0x22   :  { %51 = dma.hbm_to_vmem [thread:$0]  %s810_s3, 2048, %s46_s11, [#allocation6], %s684_s27, %s684_s27, %s685_s28  }
  0x23   :  { %s688_s17 = smov [#allocation8]  }
  0x24   :  { %s59_s18 = sshll.u32 %s688_s17, 4  ;;  %s60_s18 = int_to_ptr.vmem [resolvable:$true] %s59_s18 }
  0x25   :  { %s643_s19 = scalar_lea.vmem %s60_s18, 1024  ;;  %p648_p2 = scmp.lt.s32.totalorder %s60_s18, %s60_s18 }
  0x26   :  { %p644_p1 = scmp.ne.s32.totalorder %s60_s18, %s643_s19  ;;  %p649_p3 = scmp.lt.s32.totalorder %s643_s19, %s643_s19 }
  0x28   :  { %p650_p4 = por %p649_p3, %p648_p2 }
  0x2a   :  { %p651_p5 = pnand %p650_p4, %p644_p1 }
  0x2c   :  { %654 = shalt.err (!%p651_p5)
}
  0x2d   :  { %65 = dma.hbm_to_vmem [thread:$0]  %s812_s5, 1024, %s60_s18, [#allocation9], %s684_s27, %s684_s27, %s685_s28  }
  0x2e   :  { %675 = dma.done.wait [#allocation3], 128  }
  0x2f   :  { %676 = vsyncadd [#allocation3], 4294967168 }
  0x30   :  { %677 = dma.done.wait [#allocation6], 2560  }
  0x31   :  { %678 = vsyncadd [#allocation6], 4294964736 }
  0x32   :  { %679 = dma.done.wait [#allocation9], 1024  }
  0x33   :  { %680 = vsyncadd [#allocation9], 4294966272  ;;  %v689_v0 = vmov 0.0   ;;  %vm690_vm0 = vmmov 0   ;;  %v84_v1 = vld [vmem:[#allocation5 + $0x18] sm:$0xff]  ;;  %v83_v2 = vld [vmem:[#allocation5 + $0x10] sm:$0xff] }
  0x34   :  { %498 = vmatprep.subr.mxu0 %v689_v0  ;;  %506 = vmatprep.mubr.msk.f32.mxu0 %vm690_vm0, %v689_v0  ;;  %v175_v3 = vld [vmem:[#allocation7 + $0x38] sm:$0xff]  ;;  %v82_v4 = vld [vmem:[#allocation5 + $0x8] sm:$0xff]  ;;  %v174_v5 = vld [vmem:[#allocation7 + $0x30] sm:$0xff]  ;;  %vm92_vm1 = vcmask 261120   ;;  %vm183_vm2 = vcmask 523264   ;;  %s691_s26 = smov [#allocation10]  }
  0x35   :  { %509 = vmatprep.subr.mxu1 %v689_v0  ;;  %525 = vmatprep.mubr.msk.f32.mxu1 %vm690_vm0, %v689_v0  ;;  %v173_v6 = vld [vmem:[#allocation7 + $0x28] sm:$0xff]  ;;  %v81_v7 = vld [vmem:[#allocation5] sm:$0xff]  ;;  %v80_v8 = vld [vmem:[#allocation2] sm:$0xff]  ;;  %s446_s27 = sshll.u32 %s691_s26, 4  ;;  %s447_s27 = int_to_ptr.vmem [resolvable:$true] %s446_s27 }
  0x36   :  { %499 = vmatpush3.msra.mxu0 %v84_v1  ;;  %510 = vmatpush3.msra.mxu1 %v175_v3  ;;  %v172_v9 = vld [vmem:[#allocation7 + $0x20] sm:$0xff]  ;;  %v171_v10 = vld [vmem:[#allocation7 + $0x18] sm:$0xff]  ;;  %v170_v11 = vld [vmem:[#allocation7 + $0x10] sm:$0xff]  ;;  %s655_s28 = scalar_lea.vmem %s447_s27, 128  ;;  %p660_p7 = scmp.lt.s32.totalorder %s447_s27, %s447_s27 }
  0x37   :  { %500 = vmatprep.subr.mxu0 %v689_v0  ;;  %511 = vmatprep.subr.mxu1 %v689_v0  ;;  %v169_v12 = vld [vmem:[#allocation7 + $0x8] sm:$0xff]  ;;  %v168_v13 = vld [vmem:[#allocation7] sm:$0xff]  ;;  %v267_v14 = vld [vmem:[#allocation7 + $0x78] sm:$0xff]  ;;  %p656_p6 = scmp.ne.s32.totalorder %s447_s27, %s655_s28  ;;  %p661_p8 = scmp.lt.s32.totalorder %s655_s28, %s655_s28 }
  0x38   :  { %501 = vmatpush3.msra.mxu0 %v83_v2  ;;  %512 = vmatpush3.msra.mxu1 %v174_v5  ;;  %v266_v15 = vld [vmem:[#allocation7 + $0x70] sm:$0xff]  ;;  %v265_v16 = vld [vmem:[#allocation7 + $0x68] sm:$0xff]  ;;  %v264_v17 = vld [vmem:[#allocation7 + $0x60] sm:$0xff] }
  0x39   :  { %502 = vmatprep.subr.mxu0 %v689_v0  ;;  %513 = vmatprep.subr.mxu1 %v689_v0  ;;  %v457_v18 = vld [vmem:[%s809_s2] ss:$0 sm:$0xff]  ;;  %v262_v25 = vld [vmem:[#allocation7 + $0x50] sm:$0xff]  ;;  %v261_v26 = vld [vmem:[#allocation7 + $0x48] sm:$0xff]  ;;  %p662_p9 = por %p661_p8, %p660_p7 }
  0x3a   :  { %503 = vmatpush3.msra.mxu0 %v82_v4  ;;  %514 = vmatpush3.msra.mxu1 %v173_v6  ;;  %v263_v24 = vld [vmem:[#allocation7 + $0x58] sm:$0xff]  ;;  %v260_v27 = vld [vmem:[#allocation7 + $0x40] sm:$0xff]  ;;  %v357_v29 = vld [vmem:[#allocation8 + $0x30] sm:$0xff] }
  0x3b   :  { %504 = vmatprep.subr.mxu0 %v689_v0  ;;  %515 = vmatprep.subr.mxu1 %v689_v0  ;;  %v358_v28 = vld [vmem:[#allocation8 + $0x38] sm:$0xff]  ;;  %v356_v30 = vld [vmem:[#allocation8 + $0x28] sm:$0xff]  ;;  %v355_v31 = vld [vmem:[#allocation8 + $0x20] sm:$0xff]  ;;  %p663_p10 = pnand %p662_p9, %p656_p6 }
  0x3c   :  { %505 = vmatpush3.msra.mxu0 %v81_v7  ;;  %516 = vmatpush3.msra.mxu1 %v172_v9  ;;  %v459_v32 = vld [vmem:[%s811_s4] ss:$0 sm:$0xff]  ;;  %v353_v39 = vld [vmem:[#allocation8 + $0x10] sm:$0xff]  ;;  %v352_v40 = vld [vmem:[#allocation8 + $0x8] sm:$0xff] }
  0x3d   :  { %507 = vmatmul.mubr.msk.f32.vlgmr.msra.gmra.mxu0 %vm92_vm1, %v80_v8  ;;  %517 = vmatprep.subr.mxu1 %v689_v0  ;;  %v354_v38 = vld [vmem:[#allocation8 + $0x18] sm:$0xff]  ;;  %v351_v41 = vld [vmem:[#allocation8] sm:$0xff] }
  0x3e   :  { %528 = vmatprep.subr.mxu0 %v689_v0  ;;  %544 = vmatprep.mubr.msk.f32.mxu0 %vm690_vm0, %v689_v0  ;;  %v462_v42 = vld [vmem:[%s811_s4 + $0x1] ss:$0 sm:$0xff]  ;;  %v464_v48 = vld [vmem:[%s813_s6] ss:$0 sm:$0xff] }
  0x3f   :  { %518 = vmatpush3.msra.mxu1 %v171_v10  ;;  %529 = vmatpush3.msra.mxu0 %v267_v14 }
  0x40   :  { %519 = vmatprep.subr.mxu1 %v689_v0  ;;  %530 = vmatprep.subr.mxu0 %v689_v0 }
  0x41   :  { %520 = vmatpush3.msra.mxu1 %v170_v11  ;;  %531 = vmatpush3.msra.mxu0 %v266_v15 }
  0x42   :  { %521 = vmatprep.subr.mxu1 %v689_v0  ;;  %532 = vmatprep.subr.mxu0 %v689_v0 }
  0x43   :  { %522 = vmatpush3.msra.mxu1 %v169_v12  ;;  %533 = vmatpush3.msra.mxu0 %v265_v16 }
  0x44   :  { %523 = vmatprep.subr.mxu1 %v689_v0  ;;  %534 = vmatprep.subr.mxu0 %v689_v0 }
  0x45   :  { %524 = vmatpush3.msra.mxu1 %v168_v13  ;;  %535 = vmatpush3.msra.mxu0 %v264_v17 }
  0x46   :  { %547 = vmatprep.subr.mxu1 %v689_v0  ;;  %536 = vmatprep.subr.mxu0 %v689_v0 }
  0x47   :  { %537 = vmatpush3.msra.mxu0 %v263_v24 }
  0x48   :  { %538 = vmatprep.subr.mxu0 %v689_v0 }
  0x49   :  { %539 = vmatpush3.msra.mxu0 %v262_v25 }
  0x4a   :  { %540 = vmatprep.subr.mxu0 %v689_v0 }
  0x4b   :  { %541 = vmatpush3.msra.mxu0 %v261_v26 }
  0x4c   :  { %542 = vmatprep.subr.mxu0 %v689_v0 }
  0x4d   :  { %543 = vmatpush3.msra.mxu0 %v260_v27 }
  0xfd   :  { %v162_v19 = vpop.f32.mrf.mxu0 }
  0xfe   :  { %v163_v20 = vadd.f32 %v457_v18, %v162_v19 }
  0xff   :  { %v508_v21 = vpop.f32.mrf.mxu0 }
 0x100   :  { %v166_v22 = vmul.f32 0.01, %v163_v20 }
 0x102   :  { %v167_v23 = vmax.f32 %v163_v20, %v166_v22 }
 0x104   :  { %526 = vmatmul.mubr.msk.f32.vlgmr.msra.gmra.mxu1 %vm183_vm2, %v167_v23 }
 0x105   :  { %563 = vmatprep.mubr.msk.f32.mxu1 %vm690_vm0, %v689_v0  ;;  %548 = vmatpush3.msra.mxu1 %v358_v28 }
 0x106   :  { %549 = vmatprep.subr.mxu1 %v689_v0 }
 0x107   :  { %550 = vmatpush3.msra.mxu1 %v357_v29 }
 0x108   :  { %551 = vmatprep.subr.mxu1 %v689_v0 }
 0x109   :  { %552 = vmatpush3.msra.mxu1 %v356_v30 }
 0x10a   :  { %553 = vmatprep.subr.mxu1 %v689_v0 }
 0x10b   :  { %554 = vmatpush3.msra.mxu1 %v355_v31 }
 0x10c   :  { %555 = vmatprep.subr.mxu1 %v689_v0 }
 0x10d   :  { %556 = vmatpush3.msra.mxu1 %v354_v38 }
 0x10e   :  { %557 = vmatprep.subr.mxu1 %v689_v0 }
 0x10f   :  { %558 = vmatpush3.msra.mxu1 %v353_v39 }
 0x110   :  { %559 = vmatprep.subr.mxu1 %v689_v0 }
 0x111   :  { %560 = vmatpush3.msra.mxu1 %v352_v40 }
 0x112   :  { %561 = vmatprep.subr.mxu1 %v689_v0 }
 0x113   :  { %562 = vmatpush3.msra.mxu1 %v351_v41 }
 0x1c4   :  { %v253_v33 = vpop.f32.mrf.mxu1 }
 0x1c5   :  { %v254_v34 = vadd.f32 %v459_v32, %v253_v33 }
 0x1c6   :  { %v527_v35 = vpop.f32.mrf.mxu1 }
 0x1c7   :  { %v257_v36 = vmul.f32 0.01, %v254_v34 }
 0x1c9   :  { %v258_v37 = vmax.f32 %v254_v34, %v257_v36 }
 0x1cb   :  { %545 = vmatmul.mubr.msk.f32.vlgmr.msra.gmra.mxu0 %vm183_vm2, %v258_v37 }
 0x28b   :  { %v345_v43 = vpop.f32.mrf.mxu0 }
 0x28c   :  { %v346_v44 = vadd.f32 %v462_v42, %v345_v43 }
 0x28d   :  { %v546_v45 = vpop.f32.mrf.mxu0 }
 0x28e   :  { %v349_v46 = vmul.f32 0.01, %v346_v44 }
 0x290   :  { %v350_v47 = vmax.f32 %v346_v44, %v349_v46 }
 0x292   :  { %564 = vmatmul.mubr.msk.f32.vlgmr.msra.gmra.mxu1 %vm183_vm2, %v350_v47 }
 0x352   :  { %v435_v49 = vpop.f32.mrf.mxu1 }
 0x353   :  { %v436_v50 = vadd.f32 %v464_v48, %v435_v49 }
 0x354   :  { %v565_v51 = vpop.f32.mrf.mxu1 }
 0x355   :  { %439 = vst [vmem:[#allocation10] sm:$0xff] %v436_v50 }
 0x356   :  { %666 = shalt.err (!%p663_p10)
}
 0x357   :  { %449 = dma.vmem_to_hbm [thread:$0]  %s447_s27, 128, %s814_s7, [#allocation4]  }
 0x358   :  { %681 = dma.done.wait [#allocation4], 128  }
 0x359   :  { %682 = vsyncadd [#allocation4], 4294967168 }
 0x35a   :  { %453 = vsyncpa [#allocation3], 1 }
 0x35b   :  { %454 = vsyncpa [#allocation6], 1 }
 0x35c   :  { %455 = vsyncpa [#allocation9], 1 }
 0x35d   :  { %456 = vsyncpa [#allocation4], 1 }

</bundles_post_ra>
